<compile_context>
chip_gen: v7x
topology: tpu7x:2x2x1
jax: 0.10.0
libtpu: 0.0.40
codegen_flags: <defaults>
</compile_context>

<pallas_src>
import functools

import jax
import jax.numpy as jnp
import numpy as np
from jax import lax
from jax.experimental import pallas as pl
from jax.experimental.pallas import tpu as pltpu

NEG_SLOPE = 0.2
DROP_P = 0.04
BN_EPS = 1e-5


# ---------------------------------------------------------------------------
# Kernel 1: conv matmul (lane-dense) + bias + LeakyReLU + Dropout2d + BN stats
# ---------------------------------------------------------------------------
def _conv_fused_kernel(p_ref, w_ref, b_ref, d_ref, y_ref, stats_ref,
                       *, valid_cols, neg_slope):
    # p_ref:  (K, tm)      bf16 patch columns for this (sample, tile)
    # w_ref:  (C_out, K)   bf16 weights (resident)
    # b_ref:  (C_out, 1)   f32 bias (resident)
    # d_ref:  (C_out, 1)   f32 per-sample dropout scale (keep/(1-p) or 0)
    # y_ref:  (C_out, tm)  f32 activation output (lane-dense stores)
    # stats_ref: (C_out, 2) f32 per-tile [sum, sum-of-squares] per channel
    t = pl.program_id(1)
    tm = y_ref.shape[-1]

    acc = jnp.dot(w_ref[...], p_ref[...],
                  preferred_element_type=jnp.float32)           # (C_out, tm) f32
    acc = acc + b_ref[...]                                      # bias
    acc = jnp.where(acc >= 0.0, acc, neg_slope * acc)           # LeakyReLU
    acc = acc * d_ref[...]                                      # Dropout2d scale

    # Zero lanes beyond the real per-sample spatial extent (padding to the tile)
    # so they contribute nothing to the BatchNorm statistics.
    col = t * tm + lax.broadcasted_iota(jnp.int32, acc.shape, 1)
    acc = jnp.where(col < valid_cols, acc, 0.0)

    y_ref[...] = acc
    stats_ref[:, 0:1] = jnp.sum(acc, axis=1, keepdims=True)
    stats_ref[:, 1:2] = jnp.sum(acc * acc, axis=1, keepdims=True)


# ---------------------------------------------------------------------------
# Kernel 2: BatchNorm2d normalize-only pass (scale/shift precomputed per channel)
# ---------------------------------------------------------------------------
def _bn_apply_kernel(y_ref, sc_ref, sh_ref, o_ref):
    # y_ref/o_ref: (C_out, tm) f32; sc_ref/sh_ref: (C_out, 1) f32
    o_ref[...] = y_ref[...] * sc_ref[...] + sh_ref[...]


# ---------------------------------------------------------------------------
# Wrapper
# ---------------------------------------------------------------------------
def conv_block_forward(x, weight, bias, gamma, beta, drop_scale,
                       *, stride=1, padding=0, tm=512,
                       compute_dtype=jnp.bfloat16):
    """x: (N, C_in, H, W) NCHW. weight: (C_out, C_in, KH, KW). Returns NCHW f32."""
    N, C_in, H, W = x.shape
    C_out, _, KH, KW = weight.shape
    OH = (H + 2 * padding - KH) // stride + 1
    OW = (W + 2 * padding - KW) // stride + 1
    Msp = OH * OW                      # per-sample spatial size
    K = C_in * KH * KW

    # Lane-tile sizing: tm is a multiple of 128; per-sample spatial padded to Mp.
    tm = min(tm, pl.cdiv(Msp, 128) * 128)
    Mp = pl.cdiv(Msp, tm) * tm
    T = Mp // tm

    # --- glue: transposed im2col -> (N, K, Mp), k ordered (ci, kh, kw) -----------
    # TODO(synk): this still materializes a KH*KW-fold copy of the input in HBM; a
    # fully in-kernel shifted-window accumulation needs an in-kernel
    # (C_in, OH, OW) -> (C_in, OH*OW) relayout that does not lower cleanly, so the
    # im2col stays wrapper-side (in bf16 to halve the traffic, and with no big
    # transpose pass - the transposed formulation reshapes directly).
    xp = jnp.pad(x, ((0, 0), (0, 0), (padding, padding), (padding, padding)))
    cols = []
    for kh in range(KH):
        for kw in range(KW):
            cols.append(
                lax.slice(xp, (0, 0, kh, kw),
                          (N, C_in, kh + stride * (OH - 1) + 1,
                           kw + stride * (OW - 1) + 1),
                          (1, 1, stride, stride)))              # (N, C_in, OH, OW)
    pT = jnp.stack(cols, axis=2).reshape(N, K, Msp)             # (N, K, OH*OW)
    pT = jnp.pad(pT, ((0, 0), (0, 0), (0, Mp - Msp))).astype(compute_dtype)

    w2 = weight.reshape(C_out, K).astype(compute_dtype)         # (C_out, K)
    b2 = bias.reshape(C_out, 1).astype(jnp.float32)
    d2 = drop_scale.reshape(N, C_out, 1).astype(jnp.float32)    # per (sample, chan)

    kernel1 = functools.partial(_conv_fused_kernel,
                                valid_cols=Msp, neg_slope=NEG_SLOPE)

    y, stats = pl.pallas_call(
        kernel1,
        out_shape=(jax.ShapeDtypeStruct((N, C_out, Mp), jnp.float32),
                   jax.ShapeDtypeStruct((N, T, C_out, 2), jnp.float32)),
        grid_spec=pltpu.PrefetchScalarGridSpec(
            num_scalar_prefetch=0,
            grid=(N, T),
            in_specs=[
                pl.BlockSpec((None, K, tm), lambda n, t: (n, 0, t)),
                pl.BlockSpec((C_out, K), lambda n, t: (0, 0)),
                pl.BlockSpec((C_out, 1), lambda n, t: (0, 0)),
                pl.BlockSpec((None, C_out, 1), lambda n, t: (n, 0, 0)),
            ],
            out_specs=[
                pl.BlockSpec((None, C_out, tm), lambda n, t: (n, 0, t)),
                pl.BlockSpec((None, None, C_out, 2), lambda n, t: (n, t, 0, 0)),
            ],
        ),
        compiler_params=pltpu.CompilerParams(
            dimension_semantics=("parallel", "parallel")),
    )(pT, w2, b2, d2)

    # --- tiny per-channel stats fold (f32, negligible vs activation traffic) ----
    tot = jnp.sum(stats, axis=(0, 1))                           # (C_out, 2)
    m_total = float(N * Msp)
    mean = tot[:, 0] / m_total
    var = tot[:, 1] / m_total - mean * mean                     # biased var, f32
    scale = gamma.astype(jnp.float32) * lax.rsqrt(var + BN_EPS)
    shift = beta.astype(jnp.float32) - mean * scale
    sc2 = scale.reshape(C_out, 1)
    sh2 = shift.reshape(C_out, 1)

    out = pl.pallas_call(
        _bn_apply_kernel,
        out_shape=jax.ShapeDtypeStruct((N, C_out, Mp), jnp.float32),
        grid_spec=pltpu.PrefetchScalarGridSpec(
            num_scalar_prefetch=0,
            grid=(N, T),
            in_specs=[
                pl.BlockSpec((None, C_out, tm), lambda n, t: (n, 0, t)),
                pl.BlockSpec((C_out, 1), lambda n, t: (0, 0)),
                pl.BlockSpec((C_out, 1), lambda n, t: (0, 0)),
            ],
            out_specs=pl.BlockSpec((None, C_out, tm), lambda n, t: (n, 0, t)),
        ),
        compiler_params=pltpu.CompilerParams(
            dimension_semantics=("parallel", "parallel")),
    )(y, sc2, sh2)

    # (N, C_out, Mp) -> drop spatial padding -> NCHW (no transpose needed).
    return out[:, :, :Msp].reshape(N, C_out, OH, OW)


# ---------------------------------------------------------------------------
# Pure-JAX reference (same semantics) for verification
# ---------------------------------------------------------------------------
def conv_block_reference(x, weight, bias, gamma, beta, drop_scale,
                         *, stride=1, padding=0):
    y = lax.conv_general_dilated(
        x, weight, (stride, stride),
        [(padding, padding), (padding, padding)],
        dimension_numbers=("NCHW", "OIHW", "NCHW"))
    y = y + bias[None, :, None, None]
    y = jnp.where(y >= 0.0, y, NEG_SLOPE * y)
    y = y * drop_scale[:, :, None, None]
    mean = jnp.mean(y, axis=(0, 2, 3), keepdims=True)
    var = jnp.mean(jnp.square(y - mean), axis=(0, 2, 3), keepdims=True)
    return (y - mean) * lax.rsqrt(var + BN_EPS) * gamma[None, :, None, None] \
        + beta[None, :, None, None]


if __name__ == "__main__":
    # Small shapes: N=2, C_in=4, H=W=16, C_out=num_features=8, kernel=3,
    # stride=1, padding=0 -> OH=OW=14.
    N, C_in, H, W = 2, 4, 16, 16
    C_out, KH, KW = 8, 3, 3
    stride, padding = 1, 0

    key = jax.random.PRNGKey(0)
    kx, kw, kb, kg, kbe, kd = jax.random.split(key, 6)

    x = jax.random.normal(kx, (N, C_in, H, W), dtype=jnp.float32)
    fan_in = C_in * KH * KW
    weight = jax.random.uniform(kw, (C_out, C_in, KH, KW), dtype=jnp.float32,
                                minval=-1.0, maxval=1.0) / np.sqrt(fan_in)
    bias = jax.random.uniform(kb, (C_out,), dtype=jnp.float32,
                              minval=-1.0, maxval=1.0) / np.sqrt(fan_in)
    gamma = 1.0 + 0.1 * jax.random.normal(kg, (C_out,), dtype=jnp.float32)
    beta = 0.1 * jax.random.normal(kbe, (C_out,), dtype=jnp.float32)

    # Dropout2d mask: per (sample, channel), pre-scaled by 1/(1-p).
    # TODO(synk): PyTorch's exact dropout RNG stream is not reproducible in JAX.
    keep = jax.random.bernoulli(kd, 1.0 - DROP_P, (N, C_out))
    drop_scale = keep.astype(jnp.float32) / (1.0 - DROP_P)

    out = conv_block_forward(x, weight, bias, gamma, beta, drop_scale,
                             stride=stride, padding=padding)
    out = jax.block_until_ready(out)

    # Reference with the same bf16-rounded conv operands (accumulation in f32 in
    # both paths), so the comparison isolates kernel correctness.
    xq = x.astype(jnp.bfloat16).astype(jnp.float32)
    wq = weight.astype(jnp.bfloat16).astype(jnp.float32)
    ref = conv_block_reference(xq, wq, bias, gamma, beta, drop_scale,
                               stride=stride, padding=padding)
    np.testing.assert_allclose(np.asarray(out), np.asarray(ref),
                               rtol=1e-3, atol=1e-3)
    print("KERNEL_OK")
</pallas_src>

<mosaic_0001>
module attributes {stable_mosaic.version = 11 : i64} {
  func.func @_conv_fused_kernel(%arg0: i32, %arg1: i32, %arg2: memref<1x36x256xbf16, #tpu.memory_space<vmem>>, %arg3: memref<8x36xbf16, #tpu.memory_space<vmem>>, %arg4: memref<8x1xf32, #tpu.memory_space<vmem>>, %arg5: memref<1x8x1xf32, #tpu.memory_space<vmem>>, %arg6: memref<1x8x256xf32, #tpu.memory_space<vmem>>, %arg7: memref<1x1x8x2xf32, #tpu.memory_space<vmem>>) attributes {dimension_semantics = [#tpu.dimension_semantics<parallel>, #tpu.dimension_semantics<parallel>], iteration_bounds = array<i64: 2, 1>, scalar_prefetch = 0 : i64, scratch_operands = 0 : i64, tpu.core_type = #tpu.core_type<tc>, window_params = [{transform_indices = @transform_0, window_bounds = array<i64: 1, 36, 256>}, {pipeline_mode = #tpu.pipeline_mode<synchronous>, transform_indices = @transform_1, window_bounds = array<i64: 8, 36>}, {pipeline_mode = #tpu.pipeline_mode<synchronous>, transform_indices = @transform_2, window_bounds = array<i64: 8, 1>}, {transform_indices = @transform_3, window_bounds = array<i64: 1, 8, 1>}, {transform_indices = @transform_4, window_bounds = array<i64: 1, 8, 256>}, {transform_indices = @transform_5, window_bounds = array<i64: 1, 1, 8, 2>}]} {
    %c0 = arith.constant 0 : index
    %c0_0 = arith.constant 0 : index
    %0 = vector.load %arg3[%c0, %c0_0] : memref<8x36xbf16, #tpu.memory_space<vmem>>, vector<8x36xbf16>
    %c0_1 = arith.constant 0 : index
    %c0_2 = arith.constant 0 : index
    %c0_3 = arith.constant 0 : index
    %1 = vector.load %arg2[%c0_1, %c0_2, %c0_3] : memref<1x36x256xbf16, #tpu.memory_space<vmem>>, vector<1x36x256xbf16>
    %2 = vector.shape_cast %1 : vector<1x36x256xbf16> to vector<36x256xbf16>
    %cst = arith.constant dense<0.000000e+00> : vector<8x256xf32>
    %3 = tpu.matmul %0, %2, %cst {dimension_numbers = #tpu.dot_dimension_numbers<[1], [0], [0], [1], [0, 0, 1, 1], [], []>} : vector<8x36xbf16>, vector<36x256xbf16>, vector<8x256xf32> -> vector<8x256xf32>
    %c0_4 = arith.constant 0 : index
    %c0_5 = arith.constant 0 : index
    %4 = vector.load %arg4[%c0_4, %c0_5] : memref<8x1xf32, #tpu.memory_space<vmem>>, vector<8x1xf32>
    %5 = vector.broadcast %4 : vector<8x1xf32> to vector<8x256xf32>
    %6 = arith.addf %3, %5 : vector<8x256xf32>
    %cst_6 = arith.constant 0.000000e+00 : f32
    %7 = vector.broadcast %cst_6 : f32 to vector<8x256xf32>
    %8 = arith.cmpf oge, %6, %7 : vector<8x256xf32>
    %cst_7 = arith.constant 2.000000e-01 : f32
    %9 = vector.broadcast %cst_7 : f32 to vector<8x256xf32>
    %10 = arith.mulf %9, %6 : vector<8x256xf32>
    %11 = arith.select %8, %6, %10 : vector<8x256xi1>, vector<8x256xf32>
    %c0_8 = arith.constant 0 : index
    %c0_9 = arith.constant 0 : index
    %c0_10 = arith.constant 0 : index
    %12 = vector.load %arg5[%c0_8, %c0_9, %c0_10] : memref<1x8x1xf32, #tpu.memory_space<vmem>>, vector<1x8x1xf32>
    %13 = vector.shape_cast %12 : vector<1x8x1xf32> to vector<8x1xf32>
    %14 = vector.broadcast %13 : vector<8x1xf32> to vector<8x256xf32>
    %15 = arith.mulf %11, %14 : vector<8x256xf32>
    %c256_i32 = arith.constant 256 : i32
    %16 = arith.muli %arg1, %c256_i32 : i32
    %17 = tpu.iota {dimensions = array<i32: 1>} : vector<8x256xi32>
    %18 = vector.broadcast %16 : i32 to vector<8x256xi32>
    %19 = arith.addi %18, %17 : vector<8x256xi32>
    %c196_i32 = arith.constant 196 : i32
    %20 = vector.broadcast %c196_i32 : i32 to vector<8x256xi32>
    %21 = arith.cmpi slt, %19, %20 : vector<8x256xi32>
    %cst_11 = arith.constant 0.000000e+00 : f32
    %22 = vector.broadcast %cst_11 : f32 to vector<8x256xf32>
    %23 = arith.select %21, %15, %22 : vector<8x256xi1>, vector<8x256xf32>
    %c0_12 = arith.constant 0 : index
    %c0_13 = arith.constant 0 : index
    %c0_14 = arith.constant 0 : index
    %24 = vector.load %arg6[%c0_12, %c0_13, %c0_14] : memref<1x8x256xf32, #tpu.memory_space<vmem>>, vector<1x8x256xf32>
    %25 = vector.shape_cast %24 : vector<1x8x256xf32> to vector<8x256xf32>
    %26 = vector.shape_cast %23 : vector<8x256xf32> to vector<1x8x256xf32>
    tpu.vector_store %arg6[%c0_12, %c0_13, %c0_14], %26 {strides = array<i32>} : memref<1x8x256xf32, #tpu.memory_space<vmem>>, vector<1x8x256xf32>,
    %cst_15 = arith.constant dense<0.000000e+00> : vector<8xf32>
    %27 = vector.multi_reduction <add>, %23, %cst_15 [1] : vector<8x256xf32> to vector<8xf32>
    %28 = vector.shape_cast %27 : vector<8xf32> to vector<8x1xf32>
    %c0_16 = arith.constant 0 : index
    %c0_17 = arith.constant 0 : index
    %c0_18 = arith.constant 0 : index
    %c0_19 = arith.constant 0 : index
    %29 = vector.load %arg7[%c0_16, %c0_17, %c0_18, %c0_19] : memref<1x1x8x2xf32, #tpu.memory_space<vmem>>, vector<1x1x8x1xf32>
    %30 = vector.shape_cast %29 : vector<1x1x8x1xf32> to vector<8x1xf32>
    %31 = vector.shape_cast %28 : vector<8x1xf32> to vector<1x1x8x1xf32>
    tpu.vector_store %arg7[%c0_16, %c0_17, %c0_18, %c0_19], %31 {strides = array<i32>} : memref<1x1x8x2xf32, #tpu.memory_space<vmem>>, vector<1x1x8x1xf32>,
    %32 = arith.mulf %23, %23 : vector<8x256xf32>
    %cst_20 = arith.constant dense<0.000000e+00> : vector<8xf32>
    %33 = vector.multi_reduction <add>, %32, %cst_20 [1] : vector<8x256xf32> to vector<8xf32>
    %34 = vector.shape_cast %33 : vector<8xf32> to vector<8x1xf32>
    %c0_21 = arith.constant 0 : index
    %c0_22 = arith.constant 0 : index
    %c0_23 = arith.constant 0 : index
    %c1 = arith.constant 1 : index
    %35 = vector.load %arg7[%c0_21, %c0_22, %c0_23, %c1] : memref<1x1x8x2xf32, #tpu.memory_space<vmem>>, vector<1x1x8x1xf32>
    %36 = vector.shape_cast %35 : vector<1x1x8x1xf32> to vector<8x1xf32>
    %37 = vector.shape_cast %34 : vector<8x1xf32> to vector<1x1x8x1xf32>
    tpu.vector_store %arg7[%c0_21, %c0_22, %c0_23, %c1], %37 {strides = array<i32>} : memref<1x1x8x2xf32, #tpu.memory_space<vmem>>, vector<1x1x8x1xf32>,
    return
  }
  func.func @transform_0(%arg0: i32, %arg1: i32) -> (i32, i32, i32) {
    %c0_i32 = arith.constant 0 : i32
    %c0_i32_0 = arith.constant 0 : i32
    return %arg0, %c0_i32, %arg1 : i32, i32, i32
  }
  func.func @transform_1(%arg0: i32, %arg1: i32) -> (i32, i32) {
    %c0_i32 = arith.constant 0 : i32
    %c0_i32_0 = arith.constant 0 : i32
    %c0_i32_1 = arith.constant 0 : i32
    return %c0_i32, %c0_i32_0 : i32, i32
  }
  func.func @transform_2(%arg0: i32, %arg1: i32) -> (i32, i32) {
    %c0_i32 = arith.constant 0 : i32
    %c0_i32_0 = arith.constant 0 : i32
    %c0_i32_1 = arith.constant 0 : i32
    return %c0_i32, %c0_i32_0 : i32, i32
  }
  func.func @transform_3(%arg0: i32, %arg1: i32) -> (i32, i32, i32) {
    %c0_i32 = arith.constant 0 : i32
    %c0_i32_0 = arith.constant 0 : i32
    %c0_i32_1 = arith.constant 0 : i32
    return %arg0, %c0_i32, %c0_i32_0 : i32, i32, i32
  }
  func.func @transform_4(%arg0: i32, %arg1: i32) -> (i32, i32, i32) {
    %c0_i32 = arith.constant 0 : i32
    %c0_i32_0 = arith.constant 0 : i32
    return %arg0, %c0_i32, %arg1 : i32, i32, i32
  }
  func.func @transform_5(%arg0: i32, %arg1: i32) -> (i32, i32, i32, i32) {
    %c0_i32 = arith.constant 0 : i32
    %c0_i32_0 = arith.constant 0 : i32
    %c0_i32_1 = arith.constant 0 : i32
    return %arg0, %arg1, %c0_i32, %c0_i32_0 : i32, i32, i32, i32
  }
}

</mosaic_0001>

<bundles_post_ra>
// kernel: tpu_custom_call.1
= control target key start
LH: loop header
LB: loop body
LE: loop exit
PB: predicated region body
PF: predicated region fallthrough
CT: control target
= control target key end

     0   :  { %11 = vsyncpa [#allocation3], 0  ;;  %s896_s0 = inlined_call_operand.vmem [shape: bf16[2,36,256], index: 0, kind: input, shape index: {}]   ;;  %s897_s1 = inlined_call_operand.vmem [shape: bf16[8,36], index: 1, kind: input, shape index: {}]   ;;  %s898_s2 = inlined_call_operand.vmem [shape: f32[8,1], index: 2, kind: input, shape index: {}]   ;;  %s899_s3 = inlined_call_operand.vmem [shape: f32[2,8,1], index: 3, kind: input, shape index: {}]   ;;  %s900_s4 = inlined_call_operand.hbm [shape: f32[2,8,256], index: 4, kind: output, shape index: {0}]   ;;  %s901_s5 = inlined_call_operand.vmem [shape: f32[2,1,8,2], index: 5, kind: output, shape index: {1}]  }
   0x1   :  { %13 = vsyncpa [#allocation3 + $0x1], 0  ;;  %s766_s18 = smov 0   ;;  %s768_s19 = smov 0  }
   0x2   :  { %s770_s20 = smov 0   ;;  %s772_s21 = smov 0  }
   0x3   :  { %s774_s22 = smov 0   ;;  %s776_s23 = smov 0  }
   0x4 LB: > { %s565_s24 = sadd.s32 4294967295, %s732_s23   ;;  %s566_s25 = sadd.s32 4294967294, %s732_s23   ;;  %s732_s23 = sphi %s776_s23, %s19_s23   ;;  %s728_s22 = sphi %s774_s22, %s908_s22   ;;  %s724_s21 = sphi %s772_s21, %s907_s21   ;;  %s720_s20 = sphi %s770_s20, %s906_s20   ;;  %s716_s19 = sphi %s768_s19, %s905_s19   ;;  %s712_s18 = sphi %s766_s18, %s904_s18  }
   0x5   : > { %s31_s26 = sadd.s32 1, %s728_s22  ;;  %s136_s27 = sadd.s32 1, %s720_s20 }
   0x6   : > { %p33_p0 = scmp.ge.s32.totalorder %s31_s26, 2  ;;  %p146_p1 = scmp.ne.s32.totalorder %s720_s20, %s716_s19 }
   0x7   : > { %p147_p2 = scmp.eq.s32.totalorder %s565_s24, 1  ;;  %p152_p3 = scmp.ne.s32.totalorder %s716_s19, %s712_s18 }
   0x8   : > { %s910_s26 = smov (%p33_p0, %s31_s26), 0  ;;  %p153_p5 = scmp.eq.s32.totalorder %s566_s25, 1 }
   0x9   : > { %p806_p4 = por %p147_p2, %p146_p1  ;;  %s131_s29 = ssub.s32 %s728_s22, %s910_s26 }
   0xa   : > { %p569_p6 = scmp.ge.s32.totalorder %s732_s23, 1  ;;  %p134_p7 = scmp.eq.s32.totalorder %s131_s29, 0 }
   0xb   : > { %p813_p8 = por %p153_p5, %p152_p3  ;;  %p225_p9 = scmp.lt.s32.totalorder %s732_s23, 3 }
   0xc   : > { %s819_s6 = scalar_select %p134_p7, %s720_s20, %s136_s27  }
   0xd   : > { %p226_p10 = pnand %p569_p6, %p225_p9 }
   0xe   : > { %p269_p11 = scmp.lt.s32.totalorder (!%p226_p10), %s724_s21, 1  ;;  %v734_v0 = vmov (!%p226_p10), 0   ;;  %v297_v1 = vld [vmem:[%s898_s2] sm:$0xff] (!%p226_p10)  ;;  %vm332_vm0 = vcmask (!%p226_p10), 1041408   ;;  %vm328_vm1 = vcmask (!%p226_p10), 293888   ;;  %v395_v12 = vlaneseq (!%p226_p10)  ;;  %s256_s27 = sand.u32 (!%p226_p10), 1, %s716_s19  }
   0xf   : > { %229 = sbr.rel (%p226_p10) target bundleno = 410 (0x19a), region = 36  ;;  %371 = vmatprep.mubr.bf16.mxu0 (!%p226_p10), %v734_v0  ;;  %645 = vset.pattern.permute.xlu0 (!%p226_p10), %v734_v0  ;;  %v291_v11 = vld [vmem:[%s897_s1] sm:$0xf] (!%p226_p10)  ;;  %s570_s29 = sshll.u32 (!%p226_p10), %s256_s27, 4 }
  0x10   : > { %300 = vperm.xlu0 (!%p226_p10), %645, %v297_v1   ;;  %v396_v13 = vand.u32 (!%p226_p10), 127, %v395_v12  ;;  %s258_s7 = scalar_lea.vmem (!%p226_p10), [#allocation2], %s570_s29  ;;  %s587_s8 = sshll.u32 (!%p226_p10), %s724_s21, 8 }
  0x11   : > { %s420_s15 = scalar_lea.sflag (!%p226_p10), [#allocation3], %s256_s27 }
  0x12   : > { %v397_v20 = vadd.s32 (!%p226_p10), 128, %v396_v13 }
  0x14   : > { %vm402_vm4 = vcmp.lt.s32.totalorder (!%p226_p10), %v397_v20, 196 }
  0x16   : > { %s826_s9 = scalar_select %p269_p11, %s724_s21, 1 }
  0x18   : > { %s588_s10 = smul.u32 40, %s826_s9  ;;  %s572_s11 = sshll.u32 %s826_s9, 3 }
  0x19   : > { %s281_s14 = scalar_lea.vmem %s899_s3, %s572_s11 }
  0x1a   : > { %s276_s17 = scalar_lea.vmem %s896_s0, %s588_s10  ;;  %v386_v2 = vld [vmem:[%s281_s14] sm:$0xff]  ;;  %s443_s10 = sshll.u32 %s258_s7, 4  ;;  %s444_s10 = int_to_ptr.vmem [resolvable:$true] %s443_s10 }
  0x1b   : > { %v646_v3 = vld [vmem:[%s276_s17 + $0x4] ss:$8 sps:$4 sm:$0xff]   ;;  %389 = vperm.xlu0 %645, %v386_v2   ;;  %v648_v4 = vld [vmem:[%s276_s17] ss:$8 sps:$4 sm:$0xff]   ;;  %v649_v5 = vld [vmem:[%s276_s17 + $0x14] ss:$8 sps:$4 sm:$0xff]   ;;  %s848_s14 = scalar_lea.hbm %s900_s4, %s587_s8 }
  0x1c   : > { %339 = vmatprep.subr.bf16.mxu0 %v646_v3  ;;  %v296_v6 = vld [vmem:[%s276_s17 + $0x20] sm:$0x33]  ;;  %v651_v7 = vld [vmem:[%s276_s17 + $0x10] ss:$8 sps:$4 sm:$0xff]   ;;  %s654_s16 = scalar_lea.vmem %s444_s10, 256  ;;  %s735_s17 = smov [#allocation2]  }
  0x1d   : > { %340 = vmatpush1.bf16.msra.mxu0 %v648_v4  ;;  %v579_v8 = vcombine.high %v296_v6, %v296_v6  ;;  %v578_v9 = vcombine.low %v296_v6, %v296_v6  ;;  %p655_p12 = scmp.ne.s32.totalorder %s444_s10, %s654_s16  ;;  %s658_s24 = sshll.u32 %s735_s17, 4  ;;  %s659_s24 = int_to_ptr.vmem [resolvable:$false] %s658_s24 }
  0x1e   : > { %341 = vmatprep.subr.bf16.mxu0 %v649_v5  ;;  %s660_s25 = scalar_lea.vmem %s659_s24, 512  ;;  %p661_p1 = scmp.lt.s32.totalorder %s444_s10, %s659_s24 }
  0x1f   : > { %v334_v10 = vsel %vm332_vm0, %v578_v9, 0  ;;  %p656_p13 = pnand %p655_p12, %p806_p4  ;;  %p662_p2 = scmp.lt.s32.totalorder %s660_s25, %s654_s16 }
  0x21   : > { %342 = vmatpush1.bf16.msra.mxu0 %v651_v7  ;;  %p657_p0 = pneg %p656_p13  ;;  %p663_p3 = por %p662_p2, %p661_p1 }
  0x22   : > { %580 = vmatprep.subr.msk.bf16.mxu0 %vm332_vm0, %v579_v8 }
  0x23   : > { %p664_p5 = pnand %p663_p3, %p657_p0 }
  0x25   : > { %344 = vmatpush1.bf16.msra.mxu0 %v334_v10 }
  0x28   : > { %581 = vmatmul.mubr.msk.bf16.vlgmr.msra.gmra.mrb[0].mxu0 %vm328_vm1, %v291_v11 }
  0x8f   : > { %v301_v14 = vpop.permute.xlu0 %300 }
  0x9a   : > { %v390_v24 = vpop.permute.xlu0 %389 }
  0xfb   : > { %v373_v15 = vpop.f32.mrb[0].mxu0 }
  0xfc   : > { %v374_v16 = vadd.f32 %v373_v15, %v301_v14  ;;  %v375_v17 = vpop.f32.mrb[1].mxu0 }
  0xfd   : > { %v376_v18 = vadd.f32 %v375_v17, %v301_v14  ;;  %v377_v19 = vpop.f32.mrb[2].mxu0 }
  0xfe   : > { %v382_v21 = vmul.f32 0.2, %v374_v16  ;;  %vm380_vm2 = vcmp.ge.f32.partialorder %v374_v16, 0.0  ;;  %v378_v22 = vpop.f32.mrb[3].mxu0 }
  0xff   : > { %vm381_vm3 = vcmp.ge.f32.partialorder %v376_v18, 0.0  ;;  %v383_v23 = vmul.f32 0.2, %v376_v18 }
 0x100   : > { %v384_v25 = vsel %vm380_vm2, %v374_v16, %v382_v21 }
 0x101   : > { %v392_v26 = vmul.f32 %v390_v24, %v384_v25  ;;  %v385_v27 = vsel %vm381_vm3, %v376_v18, %v383_v23 }
 0x102   : > { %v393_v28 = vmul.f32 %v390_v24, %v385_v27 }
 0x103   : > { %405 = vst [vmem:[%s258_s7] sm:$0xff] %v392_v26  ;;  %v412_v31 = vmul.f32 %v392_v26, %v392_v26 }
 0x104   : > { %v404_v29 = vsel %vm402_vm4, %v393_v28, 0.0 }
 0x105   : > { %v407_v30 = vadd.f32 %v404_v29, %v392_v26  ;;  %406 = vst [vmem:[%s258_s7 + $0x8] sm:$0xff] %v404_v29  ;;  %v413_v32 = vmul.f32 %v404_v29, %v404_v29 }
 0x107   : > { %408 = vadd.xlane.f32.xlu1 %v407_v30  ;;  %v414_v33 = vadd.f32 %v413_v32, %v412_v31 }
 0x10b   : > { %415 = vadd.xlane.f32.xlu1 %v414_v33 }
 0x10c   : > { %667 = shalt.err (!%p664_p5)
}
 0x10d   : > { %s668_s21 = scalar_lea.hbm %s848_s14, 256  ;;  %s672_s7 = scalar_lea.hbm %s900_s4, 512 }
 0x10e   : > { %p669_p6 = scmp.ne.s32.totalorder %s848_s14, %s668_s21  ;;  %p673_p10 = scmp.lt.u32.totalorder %s848_s14, %s900_s4 }
 0x10f   : > { %p674_p11 = scmp.lt.u32.totalorder %s672_s7, %s668_s21  ;;  %p676_p13 = scmp.lt.u32.totalorder %s668_s21, %s848_s14 }
 0x110   : > { %p670_p7 = pnand %p669_p6, %p806_p4 }
 0x111   : > { %p675_p12 = por %p674_p11, %p673_p10 }
 0x112   : > { %p671_p9 = pneg %p670_p7 }
 0x113   : > { %p677_p0 = por %p676_p13, %p675_p12 }
 0x115   : > { %p678_p1 = pnand %p677_p0, %p671_p9 }
 0x117   : > { %681 = shalt.err (!%p678_p1)
}
 0x118   : > { %589 = dma.vmem_to_hbm [thread:$0]  (%p806_p4), %s444_s10, 256, %s848_s14, %s420_s15   ;;  %vm410_vm5 = vcmask 7168   ;;  %vm417_vm6 = vcmask 15368  }
 0x119   : > { %s289_s17 = scalar_lea.vmem %s901_s5, %s572_s11 }
 0x194   : > { %v409_v34 = vpop.xlane.xlu1 %408 }
 0x195   : > { %411 = vst.msk [vmem:[%s289_s17] sm:$0xff] %vm410_vm5, %v409_v34 }
 0x198   : > { %v416_v35 = vpop.xlane.xlu1 %415 }
 0x199   : > { %418 = vst.msk [vmem:[%s289_s17] sm:$0xff] %vm417_vm6, %v416_v35 }
 0x19a PF: > { %p595_p2 = scmp.ge.s32.totalorder %s732_s23, 2  ;;  %s458_s28 = sand.u32 1, %s712_s18  }
 0x19b   : > { %s459_s10 = scalar_lea.sflag [#allocation3], %s458_s28 }
 0x19c   : > { %p592_p3 = pnand %p595_p2, %p813_p8 }
 0x19e   : > { %707 = dma.done.wait (!%p592_p3), %s459_s10, 256  }
 0x19f   : > { %709 = vsyncadd (!%p592_p3), %s459_s10, 4294967040  ;;  %s19_s23 = sadd.s32 1, %s732_s23   ;;  %s904_s18 = smov %s716_s19 }
 0x1a0   : > { %p16_p4 = scmp.ge.s32.totalorder %s19_s23, 4   ;;  %s905_s19 = smov %s720_s20 }
 0x1a1   : > { %s906_s20 = smov %s819_s6  ;;  %s907_s21 = smov %s728_s22 }
 0x1a2   : > { %s908_s22 = smov %s910_s26  ;;  %18 = sbr.rel (!%p16_p4) target bundleno = 4 (0x4), region = 86 }
 0x1a9   :  { %474 = vsyncpa [#allocation3], 1 }
 0x1aa   :  { %476 = vsyncpa [#allocation3 + $0x1], 1 }

</bundles_post_ra>
